<compile_context>
chip_gen: v7x
topology: tpu7x:2x2x1
jax: 0.10.0
libtpu: 0.0.40
codegen_flags: <defaults>
</compile_context>

<pallas_src>
import functools
import numpy as np
import jax
import jax.numpy as jnp
from jax import lax
from jax.experimental import pallas as pl
from jax.experimental.pallas import tpu as pltpu

EPS = 1e-5


# ---------------------------------------------------------------------------
# The fused kernel: conv1+BN+ReLU -> conv2+BN, shortcut, add, ReLU.
# All tensors are [C, M] with M = N*OH*OW on the lane axis.
# ---------------------------------------------------------------------------
def _xresnet_block_kernel(planes_ref, masks_ref,
                          w1_ref, g1_ref, b1_ref,
                          w2_ref, g2_ref, b2_ref,
                          *rest,
                          stride, n, oh, ow, has_proj, eps):
    if has_proj:
        wid_ref, gid_ref, bid_ref, out_ref = rest
    else:
        (out_ref,) = rest

    m = n * oh * ow
    f32 = jnp.float32
    cdtype = planes_ref.dtype                       # bf16 in the production path

    # Hoist the (1 or 4) input planes out of the tap loops.
    planes = [planes_ref[p] for p in range(planes_ref.shape[0])]

    def shift_tap(plane, dy, dx):
        """plane[:, lane + dy*ow + dx] within the same image row/plane; 0 outside."""
        if dy == 0 and dx == 0:
            return plane
        delta = dy * ow + dx
        # jnp.roll (static shift -> slice+concat) keeps the semantics unambiguous;
        # pltpu.roll (XLU lane rotate) is the faster drop-in at large M.
        shifted = jnp.roll(plane, -delta, axis=1)
        return shifted * masks_ref[(dy + 1) * 3 + (dx + 1)]   # (1, M) boundary mask

    def conv3x3(get_plane, w_ref, cout, tap_map):
        """3x3 conv as 9 shifted (Cout, Cin) x (Cin, M) taps, f32 accumulation."""
        acc = jnp.zeros((cout, m), f32)
        for idx, (p, dy, dx) in enumerate(tap_map):
            tap = shift_tap(get_plane(p), dy, dx)
            acc = acc + jnp.dot(w_ref[idx], tap, preferred_element_type=f32)
        return acc

    def batch_norm(acc, g_ref, b_ref):
        """Train-mode BN: biased batch stats over the N*OH*OW lane axis."""
        mean = jnp.mean(acc, axis=1, keepdims=True)
        diff = acc - mean
        var = jnp.mean(diff * diff, axis=1, keepdims=True)
        return diff * lax.rsqrt(var + eps) * g_ref[...] + b_ref[...]

    # Static tap -> (plane index, dy, dx) maps.
    if stride == 2:
        # space-to-depth phase planes: plane a*2+b holds x[..., a::2, b::2]
        tap_map1 = [(((kh + 1) % 2) * 2 + (kw + 1) % 2,
                     -1 if kh == 0 else 0,
                     -1 if kw == 0 else 0)
                    for kh in range(3) for kw in range(3)]
    else:
        tap_map1 = [(0, kh - 1, kw - 1) for kh in range(3) for kw in range(3)]
    tap_map2 = [(0, kh - 1, kw - 1) for kh in range(3) for kw in range(3)]

    c1 = g1_ref.shape[0]
    c2 = g2_ref.shape[0]

    # convs path: conv3x3(stride)+BN+ReLU -> conv3x3+BN (zero-init gamma, no act)
    acc1 = conv3x3(lambda p: planes[p], w1_ref, c1, tap_map1)
    h1 = jnp.maximum(batch_norm(acc1, g1_ref, b1_ref), 0.0).astype(cdtype)
    acc2 = conv3x3(lambda p: h1, w2_ref, c2, tap_map2)
    y = batch_norm(acc2, g2_ref, b2_ref)

    # shortcut path: [AvgPool2d(2)] -> [1x1 conv + BN]  (both optional, as in the module)
    if stride == 2:
        pooled = 0.25 * (planes[0].astype(f32) + planes[1].astype(f32)
                         + planes[2].astype(f32) + planes[3].astype(f32))
    else:
        pooled = planes[0].astype(f32)
    if has_proj:
        sc = jnp.dot(wid_ref[...], pooled.astype(cdtype),
                     preferred_element_type=f32)
        sc = batch_norm(sc, gid_ref, bid_ref)
    else:
        sc = pooled

    out_ref[...] = jnp.maximum(y + sc, 0.0)


# ---------------------------------------------------------------------------
# Wrapper glue (pure layout transforms, hoisted + jitted once).
# ---------------------------------------------------------------------------
def _space_to_depth_planes(x_nchw, stride):
    """[N,C,H,W] -> [P, C, M]: P=1 plane (stride 1) or 4 parity planes (stride 2)."""
    n, c, h, w = x_nchw.shape
    if stride == 1:
        return jnp.transpose(x_nchw, (1, 0, 2, 3)).reshape(1, c, n * h * w)
    assert h % 2 == 0 and w % 2 == 0, "odd H/W (ceil_mode) not implemented"
    t = x_nchw.reshape(n, c, h // 2, 2, w // 2, 2)
    t = jnp.transpose(t, (3, 5, 1, 0, 2, 4))          # [a, b, C, N, H/2, W/2]
    return t.reshape(4, c, n * (h // 2) * (w // 2))


def _tap_masks(n, oh, ow):
    """Static (9, 1, M) 0/1 boundary masks indexed by (dy+1)*3 + (dx+1)."""
    m = n * oh * ow
    lane = np.arange(m)
    yy = (lane // ow) % oh
    xx = lane % ow
    masks = np.zeros((9, 1, m), np.float32)
    for dy in (-1, 0, 1):
        for dx in (-1, 0, 1):
            ok = ((yy + dy >= 0) & (yy + dy < oh)
                  & (xx + dx >= 0) & (xx + dx < ow))
            masks[(dy + 1) * 3 + (dx + 1), 0, :] = ok.astype(np.float32)
    return masks


@functools.partial(jax.jit, static_argnames=("stride", "compute_dtype"))
def xresnet_block_forward(x_nchw, params, *, stride, compute_dtype=jnp.bfloat16):
    if stride not in (1, 2):
        raise NotImplementedError("stride must be 1 or 2")
    n, cin, h, w = x_nchw.shape
    c1 = params["w1"].shape[0]
    c2 = params["w2"].shape[0]
    oh, ow = (h // 2, w // 2) if stride == 2 else (h, w)
    m = n * oh * ow
    has_proj = (cin != c2)
    f32 = jnp.float32

    planes = _space_to_depth_planes(x_nchw.astype(f32), stride).astype(compute_dtype)
    masks = jnp.asarray(_tap_masks(n, oh, ow)).astype(compute_dtype)
    w1 = jnp.transpose(params["w1"], (2, 3, 0, 1)).reshape(9, c1, cin).astype(compute_dtype)
    w2 = jnp.transpose(params["w2"], (2, 3, 0, 1)).reshape(9, c2, c1).astype(compute_dtype)

    inputs = [planes, masks,
              w1, params["g1"].reshape(c1, 1).astype(f32),
              params["b1"].reshape(c1, 1).astype(f32),
              w2, params["g2"].reshape(c2, 1).astype(f32),
              params["b2"].reshape(c2, 1).astype(f32)]
    if has_proj:
        inputs += [params["w_id"].reshape(c2, cin).astype(compute_dtype),
                   params["g_id"].reshape(c2, 1).astype(f32),
                   params["b_id"].reshape(c2, 1).astype(f32)]

    kern = functools.partial(_xresnet_block_kernel, stride=stride, n=n,
                             oh=oh, ow=ow, has_proj=has_proj, eps=EPS)

    flops = 2 * m * (9 * cin * c1 + 9 * c1 * c2 + (cin * c2 if has_proj else 0))
    bytes_accessed = int(sum(a.size * a.dtype.itemsize for a in inputs) + c2 * m * 4)

    out_flat = pl.pallas_call(
        kern,
        out_shape=jax.ShapeDtypeStruct((c2, m), f32),
        grid=(1,),
        in_specs=[pl.BlockSpec(a.shape, lambda i, nd=a.ndim: (0,) * nd)
                  for a in inputs],
        out_specs=pl.BlockSpec((c2, m), lambda i: (0, 0)),
        compiler_params=pltpu.CompilerParams(
            dimension_semantics=("arbitrary",)),
        cost_estimate=pl.CostEstimate(flops=int(flops),
                                      transcendentals=int(c1 + 2 * c2),
                                      bytes_accessed=bytes_accessed),
    )(*inputs)

    out = out_flat.reshape(c2, n, oh, ow)
    return jnp.transpose(out, (1, 0, 2, 3))           # back to NCHW


# ---------------------------------------------------------------------------
# Pure-JAX reference (mirrors the PyTorch forward, train-mode BN)
# ---------------------------------------------------------------------------
def ref_forward(x_nchw, params, stride):
    def conv2d(x, w, s, pad):
        return lax.conv_general_dilated(
            x, w, (s, s), [(pad, pad), (pad, pad)],
            dimension_numbers=("NCHW", "OIHW", "NCHW"))

    def bn(x, gamma, beta):
        mean = jnp.mean(x, axis=(0, 2, 3), keepdims=True)
        var = jnp.mean((x - mean) ** 2, axis=(0, 2, 3), keepdims=True)
        return ((x - mean) * lax.rsqrt(var + EPS) * gamma.reshape(1, -1, 1, 1)
                + beta.reshape(1, -1, 1, 1))

    n, cin, h, w = x_nchw.shape
    n_filters = params["w2"].shape[0]
    y = jnp.maximum(bn(conv2d(x_nchw, params["w1"], stride, 1),
                       params["g1"], params["b1"]), 0.0)
    y = bn(conv2d(y, params["w2"], 1, 1), params["g2"], params["b2"])
    s = x_nchw
    if stride == 2:
        s = jnp.mean(s.reshape(n, cin, h // 2, 2, w // 2, 2), axis=(3, 5))
    if cin != n_filters:
        s = bn(conv2d(s, params["w_id"], 1, 0), params["g_id"], params["b_id"])
    return jnp.maximum(y + s, 0.0)


if __name__ == "__main__":
    # XResNetBlock(expansion=1, n_inputs=4, n_hidden=8, stride=2, coordconv=False)
    expansion, n_inputs_arg, n_hidden, stride = 1, 4, 8, 2
    n_in = n_inputs_arg * expansion
    n_filters = n_hidden * expansion

    key = jax.random.PRNGKey(0)
    kx, k1, k2, k3 = jax.random.split(key, 4)
    params = {
        # conv weights in PyTorch OIHW layout, bias=False as in the module
        "w1": 0.1 * jax.random.normal(k1, (n_hidden, n_in, 3, 3), jnp.float32),
        "g1": jnp.ones((n_hidden,), jnp.float32),     # BN weight init = 1
        "b1": jnp.zeros((n_hidden,), jnp.float32),
        "w2": 0.1 * jax.random.normal(k2, (n_filters, n_hidden, 3, 3), jnp.float32),
        "g2": jnp.zeros((n_filters,), jnp.float32),   # zero_batch_norm=True -> gamma 0
        "b2": jnp.zeros((n_filters,), jnp.float32),
        "w_id": 0.1 * jax.random.normal(k3, (n_filters, n_in, 1, 1), jnp.float32),
        "g_id": jnp.ones((n_filters,), jnp.float32),
        "b_id": jnp.zeros((n_filters,), jnp.float32),
    }
    x = jax.random.normal(kx, (2, n_in, 16, 16), jnp.float32)   # NCHW like PyTorch

    ref = jax.block_until_ready(ref_forward(x, params, stride))

    # (1) algorithmic exactness: f32 MXU operands.
    out_f32 = jax.block_until_ready(
        xresnet_block_forward(x, params, stride=stride, compute_dtype=jnp.float32))
    np.testing.assert_allclose(np.asarray(out_f32), np.asarray(ref),
                               rtol=2e-3, atol=2e-3)

    # (2) production path: bf16 MXU operands / f32 accumulation + BN.
    #     Looser tolerance: bf16 operand quantization is amplified by the
    #     train-mode BN divide-by-batch-sigma; exactness is established by (1).
    out_bf16 = jax.block_until_ready(
        xresnet_block_forward(x, params, stride=stride, compute_dtype=jnp.bfloat16))
    np.testing.assert_allclose(np.asarray(out_bf16), np.asarray(ref),
                               rtol=1e-1, atol=1e-1)

    print("KERNEL_OK")
</pallas_src>

<mosaic_0001>
module attributes {stable_mosaic.version = 11 : i64} {
  func.func @_xresnet_block_kernel(%arg0: i32, %arg1: memref<4x4x128xf32, #tpu.memory_space<vmem>>, %arg2: memref<9x1x128xf32, #tpu.memory_space<vmem>>, %arg3: memref<9x8x4xf32, #tpu.memory_space<vmem>>, %arg4: memref<8x1xf32, #tpu.memory_space<vmem>>, %arg5: memref<8x1xf32, #tpu.memory_space<vmem>>, %arg6: memref<9x8x8xf32, #tpu.memory_space<vmem>>, %arg7: memref<8x1xf32, #tpu.memory_space<vmem>>, %arg8: memref<8x1xf32, #tpu.memory_space<vmem>>, %arg9: memref<8x4xf32, #tpu.memory_space<vmem>>, %arg10: memref<8x1xf32, #tpu.memory_space<vmem>>, %arg11: memref<8x1xf32, #tpu.memory_space<vmem>>, %arg12: memref<8x128xf32, #tpu.memory_space<vmem>>) attributes {dimension_semantics = [#tpu.dimension_semantics<arbitrary>], iteration_bounds = array<i64: 1>, scalar_prefetch = 0 : i64, scratch_operands = 0 : i64, tpu.core_type = #tpu.core_type<tc>, window_params = [{pipeline_mode = #tpu.pipeline_mode<synchronous>, transform_indices = @transform_0, window_bounds = array<i64: 4, 4, 128>}, {pipeline_mode = #tpu.pipeline_mode<synchronous>, transform_indices = @transform_1, window_bounds = array<i64: 9, 1, 128>}, {pipeline_mode = #tpu.pipeline_mode<synchronous>, transform_indices = @transform_2, window_bounds = array<i64: 9, 8, 4>}, {pipeline_mode = #tpu.pipeline_mode<synchronous>, transform_indices = @transform_3, window_bounds = array<i64: 8, 1>}, {pipeline_mode = #tpu.pipeline_mode<synchronous>, transform_indices = @transform_4, window_bounds = array<i64: 8, 1>}, {pipeline_mode = #tpu.pipeline_mode<synchronous>, transform_indices = @transform_5, window_bounds = array<i64: 9, 8, 8>}, {pipeline_mode = #tpu.pipeline_mode<synchronous>, transform_indices = @transform_6, window_bounds = array<i64: 8, 1>}, {pipeline_mode = #tpu.pipeline_mode<synchronous>, transform_indices = @transform_7, window_bounds = array<i64: 8, 1>}, {pipeline_mode = #tpu.pipeline_mode<synchronous>, transform_indices = @transform_8, window_bounds = array<i64: 8, 4>}, {pipeline_mode = #tpu.pipeline_mode<synchronous>, transform_indices = @transform_9, window_bounds = array<i64: 8, 1>}, {pipeline_mode = #tpu.pipeline_mode<synchronous>, transform_indices = @transform_10, window_bounds = array<i64: 8, 1>}, {pipeline_mode = #tpu.pipeline_mode<synchronous>, transform_indices = @transform_11, window_bounds = array<i64: 8, 128>}]} {
    %c0 = arith.constant 0 : index
    %c0_0 = arith.constant 0 : index
    %c0_1 = arith.constant 0 : index
    %0 = vector.load %arg1[%c0, %c0_0, %c0_1] : memref<4x4x128xf32, #tpu.memory_space<vmem>>, vector<1x4x128xf32>
    %1 = vector.shape_cast %0 : vector<1x4x128xf32> to vector<4x128xf32>
    %c1 = arith.constant 1 : index
    %c0_2 = arith.constant 0 : index
    %c0_3 = arith.constant 0 : index
    %2 = vector.load %arg1[%c1, %c0_2, %c0_3] : memref<4x4x128xf32, #tpu.memory_space<vmem>>, vector<1x4x128xf32>
    %3 = vector.shape_cast %2 : vector<1x4x128xf32> to vector<4x128xf32>
    %c2 = arith.constant 2 : index
    %c0_4 = arith.constant 0 : index
    %c0_5 = arith.constant 0 : index
    %4 = vector.load %arg1[%c2, %c0_4, %c0_5] : memref<4x4x128xf32, #tpu.memory_space<vmem>>, vector<1x4x128xf32>
    %5 = vector.shape_cast %4 : vector<1x4x128xf32> to vector<4x128xf32>
    %c3 = arith.constant 3 : index
    %c0_6 = arith.constant 0 : index
    %c0_7 = arith.constant 0 : index
    %6 = vector.load %arg1[%c3, %c0_6, %c0_7] : memref<4x4x128xf32, #tpu.memory_space<vmem>>, vector<1x4x128xf32>
    %7 = vector.shape_cast %6 : vector<1x4x128xf32> to vector<4x128xf32>
    %cst = arith.constant 0.000000e+00 : f32
    %8 = vector.broadcast %cst : f32 to vector<8x128xf32>
    %9 = vector.extract_strided_slice %7 {offsets = [0, 119], sizes = [4, 9], strides = [1, 1]} : vector<4x128xf32> to vector<4x9xf32>
    %10 = vector.extract_strided_slice %7 {offsets = [0, 0], sizes = [4, 119], strides = [1, 1]} : vector<4x128xf32> to vector<4x119xf32>
    %11 = tpu.concatenate %9, %10 in 1 : vector<4x9xf32>, vector<4x119xf32> -> vector<4x128xf32>
    %c0_8 = arith.constant 0 : index
    %c0_9 = arith.constant 0 : index
    %c0_10 = arith.constant 0 : index
    %12 = vector.load %arg2[%c0_8, %c0_9, %c0_10] : memref<9x1x128xf32, #tpu.memory_space<vmem>>, vector<1x1x128xf32>
    %13 = vector.shape_cast %12 : vector<1x1x128xf32> to vector<1x128xf32>
    %14 = vector.broadcast %13 : vector<1x128xf32> to vector<4x128xf32>
    %15 = arith.mulf %11, %14 : vector<4x128xf32>
    %c0_11 = arith.constant 0 : index
    %c0_12 = arith.constant 0 : index
    %c0_13 = arith.constant 0 : index
    %16 = vector.load %arg3[%c0_11, %c0_12, %c0_13] : memref<9x8x4xf32, #tpu.memory_space<vmem>>, vector<1x8x4xf32>
    %17 = vector.shape_cast %16 : vector<1x8x4xf32> to vector<8x4xf32>
    %cst_14 = arith.constant dense<0.000000e+00> : vector<8x128xf32>
    %18 = tpu.matmul %17, %15, %cst_14 {dimension_numbers = #tpu.dot_dimension_numbers<[1], [0], [0], [1], [0, 0, 1, 1], [], []>} : vector<8x4xf32>, vector<4x128xf32>, vector<8x128xf32> -> vector<8x128xf32>
    %19 = arith.addf %8, %18 : vector<8x128xf32>
    %20 = vector.extract_strided_slice %5 {offsets = [0, 120], sizes = [4, 8], strides = [1, 1]} : vector<4x128xf32> to vector<4x8xf32>
    %21 = vector.extract_strided_slice %5 {offsets = [0, 0], sizes = [4, 120], strides = [1, 1]} : vector<4x128xf32> to vector<4x120xf32>
    %22 = tpu.concatenate %20, %21 in 1 : vector<4x8xf32>, vector<4x120xf32> -> vector<4x128xf32>
    %c1_15 = arith.constant 1 : index
    %c0_16 = arith.constant 0 : index
    %c0_17 = arith.constant 0 : index
    %23 = vector.load %arg2[%c1_15, %c0_16, %c0_17] : memref<9x1x128xf32, #tpu.memory_space<vmem>>, vector<1x1x128xf32>
    %24 = vector.shape_cast %23 : vector<1x1x128xf32> to vector<1x128xf32>
    %25 = vector.broadcast %24 : vector<1x128xf32> to vector<4x128xf32>
    %26 = arith.mulf %22, %25 : vector<4x128xf32>
    %c1_18 = arith.constant 1 : index
    %c0_19 = arith.constant 0 : index
    %c0_20 = arith.constant 0 : index
    %27 = vector.load %arg3[%c1_18, %c0_19, %c0_20] : memref<9x8x4xf32, #tpu.memory_space<vmem>>, vector<1x8x4xf32>
    %28 = vector.shape_cast %27 : vector<1x8x4xf32> to vector<8x4xf32>
    %cst_21 = arith.constant dense<0.000000e+00> : vector<8x128xf32>
    %29 = tpu.matmul %28, %26, %cst_21 {dimension_numbers = #tpu.dot_dimension_numbers<[1], [0], [0], [1], [0, 0, 1, 1], [], []>} : vector<8x4xf32>, vector<4x128xf32>, vector<8x128xf32> -> vector<8x128xf32>
    %30 = arith.addf %19, %29 : vector<8x128xf32>
    %31 = vector.extract_strided_slice %7 {offsets = [0, 120], sizes = [4, 8], strides = [1, 1]} : vector<4x128xf32> to vector<4x8xf32>
    %32 = vector.extract_strided_slice %7 {offsets = [0, 0], sizes = [4, 120], strides = [1, 1]} : vector<4x128xf32> to vector<4x120xf32>
    %33 = tpu.concatenate %31, %32 in 1 : vector<4x8xf32>, vector<4x120xf32> -> vector<4x128xf32>
    %c1_22 = arith.constant 1 : index
    %c0_23 = arith.constant 0 : index
    %c0_24 = arith.constant 0 : index
    %34 = vector.load %arg2[%c1_22, %c0_23, %c0_24] : memref<9x1x128xf32, #tpu.memory_space<vmem>>, vector<1x1x128xf32>
    %35 = vector.shape_cast %34 : vector<1x1x128xf32> to vector<1x128xf32>
    %36 = vector.broadcast %35 : vector<1x128xf32> to vector<4x128xf32>
    %37 = arith.mulf %33, %36 : vector<4x128xf32>
    %c2_25 = arith.constant 2 : index
    %c0_26 = arith.constant 0 : index
    %c0_27 = arith.constant 0 : index
    %38 = vector.load %arg3[%c2_25, %c0_26, %c0_27] : memref<9x8x4xf32, #tpu.memory_space<vmem>>, vector<1x8x4xf32>
    %39 = vector.shape_cast %38 : vector<1x8x4xf32> to vector<8x4xf32>
    %cst_28 = arith.constant dense<0.000000e+00> : vector<8x128xf32>
    %40 = tpu.matmul %39, %37, %cst_28 {dimension_numbers = #tpu.dot_dimension_numbers<[1], [0], [0], [1], [0, 0, 1, 1], [], []>} : vector<8x4xf32>, vector<4x128xf32>, vector<8x128xf32> -> vector<8x128xf32>
    %41 = arith.addf %30, %40 : vector<8x128xf32>
    %42 = vector.extract_strided_slice %3 {offsets = [0, 127], sizes = [4, 1], strides = [1, 1]} : vector<4x128xf32> to vector<4x1xf32>
    %43 = vector.extract_strided_slice %3 {offsets = [0, 0], sizes = [4, 127], strides = [1, 1]} : vector<4x128xf32> to vector<4x127xf32>
    %44 = tpu.concatenate %42, %43 in 1 : vector<4x1xf32>, vector<4x127xf32> -> vector<4x128xf32>
    %c3_29 = arith.constant 3 : index
    %c0_30 = arith.constant 0 : index
    %c0_31 = arith.constant 0 : index
    %45 = vector.load %arg2[%c3_29, %c0_30, %c0_31] : memref<9x1x128xf32, #tpu.memory_space<vmem>>, vector<1x1x128xf32>
    %46 = vector.shape_cast %45 : vector<1x1x128xf32> to vector<1x128xf32>
    %47 = vector.broadcast %46 : vector<1x128xf32> to vector<4x128xf32>
    %48 = arith.mulf %44, %47 : vector<4x128xf32>
    %c3_32 = arith.constant 3 : index
    %c0_33 = arith.constant 0 : index
    %c0_34 = arith.constant 0 : index
    %49 = vector.load %arg3[%c3_32, %c0_33, %c0_34] : memref<9x8x4xf32, #tpu.memory_space<vmem>>, vector<1x8x4xf32>
    %50 = vector.shape_cast %49 : vector<1x8x4xf32> to vector<8x4xf32>
    %cst_35 = arith.constant dense<0.000000e+00> : vector<8x128xf32>
    %51 = tpu.matmul %50, %48, %cst_35 {dimension_numbers = #tpu.dot_dimension_numbers<[1], [0], [0], [1], [0, 0, 1, 1], [], []>} : vector<8x4xf32>, vector<4x128xf32>, vector<8x128xf32> -> vector<8x128xf32>
    %52 = arith.addf %41, %51 : vector<8x128xf32>
    %c4 = arith.constant 4 : index
    %c0_36 = arith.constant 0 : index
    %c0_37 = arith.constant 0 : index
    %53 = vector.load %arg3[%c4, %c0_36, %c0_37] : memref<9x8x4xf32, #tpu.memory_space<vmem>>, vector<1x8x4xf32>
    %54 = vector.shape_cast %53 : vector<1x8x4xf32> to vector<8x4xf32>
    %cst_38 = arith.constant dense<0.000000e+00> : vector<8x128xf32>
    %55 = tpu.matmul %54, %1, %cst_38 {dimension_numbers = #tpu.dot_dimension_numbers<[1], [0], [0], [1], [0, 0, 1, 1], [], []>} : vector<8x4xf32>, vector<4x128xf32>, vector<8x128xf32> -> vector<8x128xf32>
    %56 = arith.addf %52, %55 : vector<8x128xf32>
    %c5 = arith.constant 5 : index
    %c0_39 = arith.constant 0 : index
    %c0_40 = arith.constant 0 : index
    %57 = vector.load %arg3[%c5, %c0_39, %c0_40] : memref<9x8x4xf32, #tpu.memory_space<vmem>>, vector<1x8x4xf32>
    %58 = vector.shape_cast %57 : vector<1x8x4xf32> to vector<8x4xf32>
    %cst_41 = arith.constant dense<0.000000e+00> : vector<8x128xf32>
    %59 = tpu.matmul %58, %3, %cst_41 {dimension_numbers = #tpu.dot_dimension_numbers<[1], [0], [0], [1], [0, 0, 1, 1], [], []>} : vector<8x4xf32>, vector<4x128xf32>, vector<8x128xf32> -> vector<8x128xf32>
    %60 = arith.addf %56, %59 : vector<8x128xf32>
    %61 = vector.extract_strided_slice %7 {offsets = [0, 127], sizes = [4, 1], strides = [1, 1]} : vector<4x128xf32> to vector<4x1xf32>
    %62 = vector.extract_strided_slice %7 {offsets = [0, 0], sizes = [4, 127], strides = [1, 1]} : vector<4x128xf32> to vector<4x127xf32>
    %63 = tpu.concatenate %61, %62 in 1 : vector<4x1xf32>, vector<4x127xf32> -> vector<4x128xf32>
    %c3_42 = arith.constant 3 : index
    %c0_43 = arith.constant 0 : index
    %c0_44 = arith.constant 0 : index
    %64 = vector.load %arg2[%c3_42, %c0_43, %c0_44] : memref<9x1x128xf32, #tpu.memory_space<vmem>>, vector<1x1x128xf32>
    %65 = vector.shape_cast %64 : vector<1x1x128xf32> to vector<1x128xf32>
    %66 = vector.broadcast %65 : vector<1x128xf32> to vector<4x128xf32>
    %67 = arith.mulf %63, %66 : vector<4x128xf32>
    %c6 = arith.constant 6 : index
    %c0_45 = arith.constant 0 : index
    %c0_46 = arith.constant 0 : index
    %68 = vector.load %arg3[%c6, %c0_45, %c0_46] : memref<9x8x4xf32, #tpu.memory_space<vmem>>, vector<1x8x4xf32>
    %69 = vector.shape_cast %68 : vector<1x8x4xf32> to vector<8x4xf32>
    %cst_47 = arith.constant dense<0.000000e+00> : vector<8x128xf32>
    %70 = tpu.matmul %69, %67, %cst_47 {dimension_numbers = #tpu.dot_dimension_numbers<[1], [0], [0], [1], [0, 0, 1, 1], [], []>} : vector<8x4xf32>, vector<4x128xf32>, vector<8x128xf32> -> vector<8x128xf32>
    %71 = arith.addf %60, %70 : vector<8x128xf32>
    %c7 = arith.constant 7 : index
    %c0_48 = arith.constant 0 : index
    %c0_49 = arith.constant 0 : index
    %72 = vector.load %arg3[%c7, %c0_48, %c0_49] : memref<9x8x4xf32, #tpu.memory_space<vmem>>, vector<1x8x4xf32>
    %73 = vector.shape_cast %72 : vector<1x8x4xf32> to vector<8x4xf32>
    %cst_50 = arith.constant dense<0.000000e+00> : vector<8x128xf32>
    %74 = tpu.matmul %73, %5, %cst_50 {dimension_numbers = #tpu.dot_dimension_numbers<[1], [0], [0], [1], [0, 0, 1, 1], [], []>} : vector<8x4xf32>, vector<4x128xf32>, vector<8x128xf32> -> vector<8x128xf32>
    %75 = arith.addf %71, %74 : vector<8x128xf32>
    %c8 = arith.constant 8 : index
    %c0_51 = arith.constant 0 : index
    %c0_52 = arith.constant 0 : index
    %76 = vector.load %arg3[%c8, %c0_51, %c0_52] : memref<9x8x4xf32, #tpu.memory_space<vmem>>, vector<1x8x4xf32>
    %77 = vector.shape_cast %76 : vector<1x8x4xf32> to vector<8x4xf32>
    %cst_53 = arith.constant dense<0.000000e+00> : vector<8x128xf32>
    %78 = tpu.matmul %77, %7, %cst_53 {dimension_numbers = #tpu.dot_dimension_numbers<[1], [0], [0], [1], [0, 0, 1, 1], [], []>} : vector<8x4xf32>, vector<4x128xf32>, vector<8x128xf32> -> vector<8x128xf32>
    %79 = arith.addf %75, %78 : vector<8x128xf32>
    %cst_54 = arith.constant dense<0.000000e+00> : vector<8xf32>
    %80 = vector.multi_reduction <add>, %79, %cst_54 [1] : vector<8x128xf32> to vector<8xf32>
    %81 = vector.shape_cast %80 : vector<8xf32> to vector<8x1xf32>
    %cst_55 = arith.constant 1.280000e+02 : f32
    %82 = vector.broadcast %cst_55 : f32 to vector<8x1xf32>
    %83 = arith.divf %81, %82 : vector<8x1xf32>
    %84 = vector.broadcast %83 : vector<8x1xf32> to vector<8x128xf32>
    %85 = arith.subf %79, %84 : vector<8x128xf32>
    %86 = arith.mulf %85, %85 : vector<8x128xf32>
    %cst_56 = arith.constant dense<0.000000e+00> : vector<8xf32>
    %87 = vector.multi_reduction <add>, %86, %cst_56 [1] : vector<8x128xf32> to vector<8xf32>
    %88 = vector.shape_cast %87 : vector<8xf32> to vector<8x1xf32>
    %cst_57 = arith.constant 1.280000e+02 : f32
    %89 = vector.broadcast %cst_57 : f32 to vector<8x1xf32>
    %90 = arith.divf %88, %89 : vector<8x1xf32>
    %cst_58 = arith.constant 9.99999974E-6 : f32
    %91 = vector.broadcast %cst_58 : f32 to vector<8x1xf32>
    %92 = arith.addf %90, %91 : vector<8x1xf32>
    %93 = math.rsqrt %92 : vector<8x1xf32>
    %94 = vector.broadcast %93 : vector<8x1xf32> to vector<8x128xf32>
    %95 = arith.mulf %85, %94 : vector<8x128xf32>
    %c0_59 = arith.constant 0 : index
    %c0_60 = arith.constant 0 : index
    %96 = vector.load %arg4[%c0_59, %c0_60] : memref<8x1xf32, #tpu.memory_space<vmem>>, vector<8x1xf32>
    %97 = vector.broadcast %96 : vector<8x1xf32> to vector<8x128xf32>
    %98 = arith.mulf %95, %97 : vector<8x128xf32>
    %c0_61 = arith.constant 0 : index
    %c0_62 = arith.constant 0 : index
    %99 = vector.load %arg5[%c0_61, %c0_62] : memref<8x1xf32, #tpu.memory_space<vmem>>, vector<8x1xf32>
    %100 = vector.broadcast %99 : vector<8x1xf32> to vector<8x128xf32>
    %101 = arith.addf %98, %100 : vector<8x128xf32>
    %cst_63 = arith.constant 0.000000e+00 : f32
    %102 = vector.broadcast %cst_63 : f32 to vector<8x128xf32>
    %103 = arith.maximumf %101, %102 : vector<8x128xf32>
    %cst_64 = arith.constant 0.000000e+00 : f32
    %104 = vector.broadcast %cst_64 : f32 to vector<8x128xf32>
    %105 = vector.extract_strided_slice %103 {offsets = [0, 119], sizes = [8, 9], strides = [1, 1]} : vector<8x128xf32> to vector<8x9xf32>
    %106 = vector.extract_strided_slice %103 {offsets = [0, 0], sizes = [8, 119], strides = [1, 1]} : vector<8x128xf32> to vector<8x119xf32>
    %107 = tpu.concatenate %105, %106 in 1 : vector<8x9xf32>, vector<8x119xf32> -> vector<8x128xf32>
    %c0_65 = arith.constant 0 : index
    %c0_66 = arith.constant 0 : index
    %c0_67 = arith.constant 0 : index
    %108 = vector.load %arg2[%c0_65, %c0_66, %c0_67] : memref<9x1x128xf32, #tpu.memory_space<vmem>>, vector<1x1x128xf32>
    %109 = vector.shape_cast %108 : vector<1x1x128xf32> to vector<1x128xf32>
    %110 = vector.broadcast %109 : vector<1x128xf32> to vector<8x128xf32>
    %111 = arith.mulf %107, %110 : vector<8x128xf32>
    %c0_68 = arith.constant 0 : index
    %c0_69 = arith.constant 0 : index
    %c0_70 = arith.constant 0 : index
    %112 = vector.load %arg6[%c0_68, %c0_69, %c0_70] : memref<9x8x8xf32, #tpu.memory_space<vmem>>, vector<1x8x8xf32>
    %113 = vector.shape_cast %112 : vector<1x8x8xf32> to vector<8x8xf32>
    %cst_71 = arith.constant dense<0.000000e+00> : vector<8x128xf32>
    %114 = tpu.matmul %113, %111, %cst_71 {dimension_numbers = #tpu.dot_dimension_numbers<[1], [0], [0], [1], [0, 0, 1, 1], [], []>} : vector<8x8xf32>, vector<8x128xf32>, vector<8x128xf32> -> vector<8x128xf32>
    %115 = arith.addf %104, %114 : vector<8x128xf32>
    %116 = vector.extract_strided_slice %103 {offsets = [0, 120], sizes = [8, 8], strides = [1, 1]} : vector<8x128xf32> to vector<8x8xf32>
    %117 = vector.extract_strided_slice %103 {offsets = [0, 0], sizes = [8, 120], strides = [1, 1]} : vector<8x128xf32> to vector<8x120xf32>
    %118 = tpu.concatenate %116, %117 in 1 : vector<8x8xf32>, vector<8x120xf32> -> vector<8x128xf32>
    %c1_72 = arith.constant 1 : index
    %c0_73 = arith.constant 0 : index
    %c0_74 = arith.constant 0 : index
    %119 = vector.load %arg2[%c1_72, %c0_73, %c0_74] : memref<9x1x128xf32, #tpu.memory_space<vmem>>, vector<1x1x128xf32>
    %120 = vector.shape_cast %119 : vector<1x1x128xf32> to vector<1x128xf32>
    %121 = vector.broadcast %120 : vector<1x128xf32> to vector<8x128xf32>
    %122 = arith.mulf %118, %121 : vector<8x128xf32>
    %c1_75 = arith.constant 1 : index
    %c0_76 = arith.constant 0 : index
    %c0_77 = arith.constant 0 : index
    %123 = vector.load %arg6[%c1_75, %c0_76, %c0_77] : memref<9x8x8xf32, #tpu.memory_space<vmem>>, vector<1x8x8xf32>
    %124 = vector.shape_cast %123 : vector<1x8x8xf32> to vector<8x8xf32>
    %cst_78 = arith.constant dense<0.000000e+00> : vector<8x128xf32>
    %125 = tpu.matmul %124, %122, %cst_78 {dimension_numbers = #tpu.dot_dimension_numbers<[1], [0], [0], [1], [0, 0, 1, 1], [], []>} : vector<8x8xf32>, vector<8x128xf32>, vector<8x128xf32> -> vector<8x128xf32>
    %126 = arith.addf %115, %125 : vector<8x128xf32>
    %127 = vector.extract_strided_slice %103 {offsets = [0, 121], sizes = [8, 7], strides = [1, 1]} : vector<8x128xf32> to vector<8x7xf32>
    %128 = vector.extract_strided_slice %103 {offsets = [0, 0], sizes = [8, 121], strides = [1, 1]} : vector<8x128xf32> to vector<8x121xf32>
    %129 = tpu.concatenate %127, %128 in 1 : vector<8x7xf32>, vector<8x121xf32> -> vector<8x128xf32>
    %c2_79 = arith.constant 2 : index
    %c0_80 = arith.constant 0 : index
    %c0_81 = arith.constant 0 : index
    %130 = vector.load %arg2[%c2_79, %c0_80, %c0_81] : memref<9x1x128xf32, #tpu.memory_space<vmem>>, vector<1x1x128xf32>
    %131 = vector.shape_cast %130 : vector<1x1x128xf32> to vector<1x128xf32>
    %132 = vector.broadcast %131 : vector<1x128xf32> to vector<8x128xf32>
    %133 = arith.mulf %129, %132 : vector<8x128xf32>
    %c2_82 = arith.constant 2 : index
    %c0_83 = arith.constant 0 : index
    %c0_84 = arith.constant 0 : index
    %134 = vector.load %arg6[%c2_82, %c0_83, %c0_84] : memref<9x8x8xf32, #tpu.memory_space<vmem>>, vector<1x8x8xf32>
    %135 = vector.shape_cast %134 : vector<1x8x8xf32> to vector<8x8xf32>
    %cst_85 = arith.constant dense<0.000000e+00> : vector<8x128xf32>
    %136 = tpu.matmul %135, %133, %cst_85 {dimension_numbers = #tpu.dot_dimension_numbers<[1], [0], [0], [1], [0, 0, 1, 1], [], []>} : vector<8x8xf32>, vector<8x128xf32>, vector<8x128xf32> -> vector<8x128xf32>
    %137 = arith.addf %126, %136 : vector<8x128xf32>
    %138 = vector.extract_strided_slice %103 {offsets = [0, 127], sizes = [8, 1], strides = [1, 1]} : vector<8x128xf32> to vector<8x1xf32>
    %139 = vector.extract_strided_slice %103 {offsets = [0, 0], sizes = [8, 127], strides = [1, 1]} : vector<8x128xf32> to vector<8x127xf32>
    %140 = tpu.concatenate %138, %139 in 1 : vector<8x1xf32>, vector<8x127xf32> -> vector<8x128xf32>
    %c3_86 = arith.constant 3 : index
    %c0_87 = arith.constant 0 : index
    %c0_88 = arith.constant 0 : index
    %141 = vector.load %arg2[%c3_86, %c0_87, %c0_88] : memref<9x1x128xf32, #tpu.memory_space<vmem>>, vector<1x1x128xf32>
    %142 = vector.shape_cast %141 : vector<1x1x128xf32> to vector<1x128xf32>
    %143 = vector.broadcast %142 : vector<1x128xf32> to vector<8x128xf32>
    %144 = arith.mulf %140, %143 : vector<8x128xf32>
    %c3_89 = arith.constant 3 : index
    %c0_90 = arith.constant 0 : index
    %c0_91 = arith.constant 0 : index
    %145 = vector.load %arg6[%c3_89, %c0_90, %c0_91] : memref<9x8x8xf32, #tpu.memory_space<vmem>>, vector<1x8x8xf32>
    %146 = vector.shape_cast %145 : vector<1x8x8xf32> to vector<8x8xf32>
    %cst_92 = arith.constant dense<0.000000e+00> : vector<8x128xf32>
    %147 = tpu.matmul %146, %144, %cst_92 {dimension_numbers = #tpu.dot_dimension_numbers<[1], [0], [0], [1], [0, 0, 1, 1], [], []>} : vector<8x8xf32>, vector<8x128xf32>, vector<8x128xf32> -> vector<8x128xf32>
    %148 = arith.addf %137, %147 : vector<8x128xf32>
    %c4_93 = arith.constant 4 : index
    %c0_94 = arith.constant 0 : index
    %c0_95 = arith.constant 0 : index
    %149 = vector.load %arg6[%c4_93, %c0_94, %c0_95] : memref<9x8x8xf32, #tpu.memory_space<vmem>>, vector<1x8x8xf32>
    %150 = vector.shape_cast %149 : vector<1x8x8xf32> to vector<8x8xf32>
    %cst_96 = arith.constant dense<0.000000e+00> : vector<8x128xf32>
    %151 = tpu.matmul %150, %103, %cst_96 {dimension_numbers = #tpu.dot_dimension_numbers<[1], [0], [0], [1], [0, 0, 1, 1], [], []>} : vector<8x8xf32>, vector<8x128xf32>, vector<8x128xf32> -> vector<8x128xf32>
    %152 = arith.addf %148, %151 : vector<8x128xf32>
    %153 = vector.extract_strided_slice %103 {offsets = [0, 1], sizes = [8, 127], strides = [1, 1]} : vector<8x128xf32> to vector<8x127xf32>
    %154 = vector.extract_strided_slice %103 {offsets = [0, 0], sizes = [8, 1], strides = [1, 1]} : vector<8x128xf32> to vector<8x1xf32>
    %155 = tpu.concatenate %153, %154 in 1 : vector<8x127xf32>, vector<8x1xf32> -> vector<8x128xf32>
    %c5_97 = arith.constant 5 : index
    %c0_98 = arith.constant 0 : index
    %c0_99 = arith.constant 0 : index
    %156 = vector.load %arg2[%c5_97, %c0_98, %c0_99] : memref<9x1x128xf32, #tpu.memory_space<vmem>>, vector<1x1x128xf32>
    %157 = vector.shape_cast %156 : vector<1x1x128xf32> to vector<1x128xf32>
    %158 = vector.broadcast %157 : vector<1x128xf32> to vector<8x128xf32>
    %159 = arith.mulf %155, %158 : vector<8x128xf32>
    %c5_100 = arith.constant 5 : index
    %c0_101 = arith.constant 0 : index
    %c0_102 = arith.constant 0 : index
    %160 = vector.load %arg6[%c5_100, %c0_101, %c0_102] : memref<9x8x8xf32, #tpu.memory_space<vmem>>, vector<1x8x8xf32>
    %161 = vector.shape_cast %160 : vector<1x8x8xf32> to vector<8x8xf32>
    %cst_103 = arith.constant dense<0.000000e+00> : vector<8x128xf32>
    %162 = tpu.matmul %161, %159, %cst_103 {dimension_numbers = #tpu.dot_dimension_numbers<[1], [0], [0], [1], [0, 0, 1, 1], [], []>} : vector<8x8xf32>, vector<8x128xf32>, vector<8x128xf32> -> vector<8x128xf32>
    %163 = arith.addf %152, %162 : vector<8x128xf32>
    %164 = vector.extract_strided_slice %103 {offsets = [0, 7], sizes = [8, 121], strides = [1, 1]} : vector<8x128xf32> to vector<8x121xf32>
    %165 = vector.extract_strided_slice %103 {offsets = [0, 0], sizes = [8, 7], strides = [1, 1]} : vector<8x128xf32> to vector<8x7xf32>
    %166 = tpu.concatenate %164, %165 in 1 : vector<8x121xf32>, vector<8x7xf32> -> vector<8x128xf32>
    %c6_104 = arith.constant 6 : index
    %c0_105 = arith.constant 0 : index
    %c0_106 = arith.constant 0 : index
    %167 = vector.load %arg2[%c6_104, %c0_105, %c0_106] : memref<9x1x128xf32, #tpu.memory_space<vmem>>, vector<1x1x128xf32>
    %168 = vector.shape_cast %167 : vector<1x1x128xf32> to vector<1x128xf32>
    %169 = vector.broadcast %168 : vector<1x128xf32> to vector<8x128xf32>
    %170 = arith.mulf %166, %169 : vector<8x128xf32>
    %c6_107 = arith.constant 6 : index
    %c0_108 = arith.constant 0 : index
    %c0_109 = arith.constant 0 : index
    %171 = vector.load %arg6[%c6_107, %c0_108, %c0_109] : memref<9x8x8xf32, #tpu.memory_space<vmem>>, vector<1x8x8xf32>
    %172 = vector.shape_cast %171 : vector<1x8x8xf32> to vector<8x8xf32>
    %cst_110 = arith.constant dense<0.000000e+00> : vector<8x128xf32>
    %173 = tpu.matmul %172, %170, %cst_110 {dimension_numbers = #tpu.dot_dimension_numbers<[1], [0], [0], [1], [0, 0, 1, 1], [], []>} : vector<8x8xf32>, vector<8x128xf32>, vector<8x128xf32> -> vector<8x128xf32>
    %174 = arith.addf %163, %173 : vector<8x128xf32>
    %175 = vector.extract_strided_slice %103 {offsets = [0, 8], sizes = [8, 120], strides = [1, 1]} : vector<8x128xf32> to vector<8x120xf32>
    %176 = vector.extract_strided_slice %103 {offsets = [0, 0], sizes = [8, 8], strides = [1, 1]} : vector<8x128xf32> to vector<8x8xf32>
    %177 = tpu.concatenate %175, %176 in 1 : vector<8x120xf32>, vector<8x8xf32> -> vector<8x128xf32>
    %c7_111 = arith.constant 7 : index
    %c0_112 = arith.constant 0 : index
    %c0_113 = arith.constant 0 : index
    %178 = vector.load %arg2[%c7_111, %c0_112, %c0_113] : memref<9x1x128xf32, #tpu.memory_space<vmem>>, vector<1x1x128xf32>
    %179 = vector.shape_cast %178 : vector<1x1x128xf32> to vector<1x128xf32>
    %180 = vector.broadcast %179 : vector<1x128xf32> to vector<8x128xf32>
    %181 = arith.mulf %177, %180 : vector<8x128xf32>
    %c7_114 = arith.constant 7 : index
    %c0_115 = arith.constant 0 : index
    %c0_116 = arith.constant 0 : index
    %182 = vector.load %arg6[%c7_114, %c0_115, %c0_116] : memref<9x8x8xf32, #tpu.memory_space<vmem>>, vector<1x8x8xf32>
    %183 = vector.shape_cast %182 : vector<1x8x8xf32> to vector<8x8xf32>
    %cst_117 = arith.constant dense<0.000000e+00> : vector<8x128xf32>
    %184 = tpu.matmul %183, %181, %cst_117 {dimension_numbers = #tpu.dot_dimension_numbers<[1], [0], [0], [1], [0, 0, 1, 1], [], []>} : vector<8x8xf32>, vector<8x128xf32>, vector<8x128xf32> -> vector<8x128xf32>
    %185 = arith.addf %174, %184 : vector<8x128xf32>
    %186 = vector.extract_strided_slice %103 {offsets = [0, 9], sizes = [8, 119], strides = [1, 1]} : vector<8x128xf32> to vector<8x119xf32>
    %187 = vector.extract_strided_slice %103 {offsets = [0, 0], sizes = [8, 9], strides = [1, 1]} : vector<8x128xf32> to vector<8x9xf32>
    %188 = tpu.concatenate %186, %187 in 1 : vector<8x119xf32>, vector<8x9xf32> -> vector<8x128xf32>
    %c8_118 = arith.constant 8 : index
    %c0_119 = arith.constant 0 : index
    %c0_120 = arith.constant 0 : index
    %189 = vector.load %arg2[%c8_118, %c0_119, %c0_120] : memref<9x1x128xf32, #tpu.memory_space<vmem>>, vector<1x1x128xf32>
    %190 = vector.shape_cast %189 : vector<1x1x128xf32> to vector<1x128xf32>
    %191 = vector.broadcast %190 : vector<1x128xf32> to vector<8x128xf32>
    %192 = arith.mulf %188, %191 : vector<8x128xf32>
    %c8_121 = arith.constant 8 : index
    %c0_122 = arith.constant 0 : index
    %c0_123 = arith.constant 0 : index
    %193 = vector.load %arg6[%c8_121, %c0_122, %c0_123] : memref<9x8x8xf32, #tpu.memory_space<vmem>>, vector<1x8x8xf32>
    %194 = vector.shape_cast %193 : vector<1x8x8xf32> to vector<8x8xf32>
    %cst_124 = arith.constant dense<0.000000e+00> : vector<8x128xf32>
    %195 = tpu.matmul %194, %192, %cst_124 {dimension_numbers = #tpu.dot_dimension_numbers<[1], [0], [0], [1], [0, 0, 1, 1], [], []>} : vector<8x8xf32>, vector<8x128xf32>, vector<8x128xf32> -> vector<8x128xf32>
    %196 = arith.addf %185, %195 : vector<8x128xf32>
    %cst_125 = arith.constant dense<0.000000e+00> : vector<8xf32>
    %197 = vector.multi_reduction <add>, %196, %cst_125 [1] : vector<8x128xf32> to vector<8xf32>
    %198 = vector.shape_cast %197 : vector<8xf32> to vector<8x1xf32>
    %cst_126 = arith.constant 1.280000e+02 : f32
    %199 = vector.broadcast %cst_126 : f32 to vector<8x1xf32>
    %200 = arith.divf %198, %199 : vector<8x1xf32>
    %201 = vector.broadcast %200 : vector<8x1xf32> to vector<8x128xf32>
    %202 = arith.subf %196, %201 : vector<8x128xf32>
    %203 = arith.mulf %202, %202 : vector<8x128xf32>
    %cst_127 = arith.constant dense<0.000000e+00> : vector<8xf32>
    %204 = vector.multi_reduction <add>, %203, %cst_127 [1] : vector<8x128xf32> to vector<8xf32>
    %205 = vector.shape_cast %204 : vector<8xf32> to vector<8x1xf32>
    %cst_128 = arith.constant 1.280000e+02 : f32
    %206 = vector.broadcast %cst_128 : f32 to vector<8x1xf32>
    %207 = arith.divf %205, %206 : vector<8x1xf32>
    %cst_129 = arith.constant 9.99999974E-6 : f32
    %208 = vector.broadcast %cst_129 : f32 to vector<8x1xf32>
    %209 = arith.addf %207, %208 : vector<8x1xf32>
    %210 = math.rsqrt %209 : vector<8x1xf32>
    %211 = vector.broadcast %210 : vector<8x1xf32> to vector<8x128xf32>
    %212 = arith.mulf %202, %211 : vector<8x128xf32>
    %c0_130 = arith.constant 0 : index
    %c0_131 = arith.constant 0 : index
    %213 = vector.load %arg7[%c0_130, %c0_131] : memref<8x1xf32, #tpu.memory_space<vmem>>, vector<8x1xf32>
    %214 = vector.broadcast %213 : vector<8x1xf32> to vector<8x128xf32>
    %215 = arith.mulf %212, %214 : vector<8x128xf32>
    %c0_132 = arith.constant 0 : index
    %c0_133 = arith.constant 0 : index
    %216 = vector.load %arg8[%c0_132, %c0_133] : memref<8x1xf32, #tpu.memory_space<vmem>>, vector<8x1xf32>
    %217 = vector.broadcast %216 : vector<8x1xf32> to vector<8x128xf32>
    %218 = arith.addf %215, %217 : vector<8x128xf32>
    %219 = arith.addf %1, %3 : vector<4x128xf32>
    %220 = arith.addf %219, %5 : vector<4x128xf32>
    %221 = arith.addf %220, %7 : vector<4x128xf32>
    %cst_134 = arith.constant 2.500000e-01 : f32
    %222 = vector.broadcast %cst_134 : f32 to vector<4x128xf32>
    %223 = arith.mulf %222, %221 : vector<4x128xf32>
    %c0_135 = arith.constant 0 : index
    %c0_136 = arith.constant 0 : index
    %224 = vector.load %arg9[%c0_135, %c0_136] : memref<8x4xf32, #tpu.memory_space<vmem>>, vector<8x4xf32>
    %cst_137 = arith.constant dense<0.000000e+00> : vector<8x128xf32>
    %225 = tpu.matmul %224, %223, %cst_137 {dimension_numbers = #tpu.dot_dimension_numbers<[1], [0], [0], [1], [0, 0, 1, 1], [], []>} : vector<8x4xf32>, vector<4x128xf32>, vector<8x128xf32> -> vector<8x128xf32>
    %cst_138 = arith.constant dense<0.000000e+00> : vector<8xf32>
    %226 = vector.multi_reduction <add>, %225, %cst_138 [1] : vector<8x128xf32> to vector<8xf32>
    %227 = vector.shape_cast %226 : vector<8xf32> to vector<8x1xf32>
    %cst_139 = arith.constant 1.280000e+02 : f32
    %228 = vector.broadcast %cst_139 : f32 to vector<8x1xf32>
    %229 = arith.divf %227, %228 : vector<8x1xf32>
    %230 = vector.broadcast %229 : vector<8x1xf32> to vector<8x128xf32>
    %231 = arith.subf %225, %230 : vector<8x128xf32>
    %232 = arith.mulf %231, %231 : vector<8x128xf32>
    %cst_140 = arith.constant dense<0.000000e+00> : vector<8xf32>
    %233 = vector.multi_reduction <add>, %232, %cst_140 [1] : vector<8x128xf32> to vector<8xf32>
    %234 = vector.shape_cast %233 : vector<8xf32> to vector<8x1xf32>
    %cst_141 = arith.constant 1.280000e+02 : f32
    %235 = vector.broadcast %cst_141 : f32 to vector<8x1xf32>
    %236 = arith.divf %234, %235 : vector<8x1xf32>
    %cst_142 = arith.constant 9.99999974E-6 : f32
    %237 = vector.broadcast %cst_142 : f32 to vector<8x1xf32>
    %238 = arith.addf %236, %237 : vector<8x1xf32>
    %239 = math.rsqrt %238 : vector<8x1xf32>
    %240 = vector.broadcast %239 : vector<8x1xf32> to vector<8x128xf32>
    %241 = arith.mulf %231, %240 : vector<8x128xf32>
    %c0_143 = arith.constant 0 : index
    %c0_144 = arith.constant 0 : index
    %242 = vector.load %arg10[%c0_143, %c0_144] : memref<8x1xf32, #tpu.memory_space<vmem>>, vector<8x1xf32>
    %243 = vector.broadcast %242 : vector<8x1xf32> to vector<8x128xf32>
    %244 = arith.mulf %241, %243 : vector<8x128xf32>
    %c0_145 = arith.constant 0 : index
    %c0_146 = arith.constant 0 : index
    %245 = vector.load %arg11[%c0_145, %c0_146] : memref<8x1xf32, #tpu.memory_space<vmem>>, vector<8x1xf32>
    %246 = vector.broadcast %245 : vector<8x1xf32> to vector<8x128xf32>
    %247 = arith.addf %244, %246 : vector<8x128xf32>
    %248 = arith.addf %218, %247 : vector<8x128xf32>
    %cst_147 = arith.constant 0.000000e+00 : f32
    %249 = vector.broadcast %cst_147 : f32 to vector<8x128xf32>
    %250 = arith.maximumf %248, %249 : vector<8x128xf32>
    %c0_148 = arith.constant 0 : index
    %c0_149 = arith.constant 0 : index
    %251 = vector.load %arg12[%c0_148, %c0_149] : memref<8x128xf32, #tpu.memory_space<vmem>>, vector<8x128xf32>
    tpu.vector_store %arg12[%c0_148, %c0_149], %250 {strides = array<i32>} : memref<8x128xf32, #tpu.memory_space<vmem>>, vector<8x128xf32>,
    return
  }
  func.func @transform_0(%arg0: i32) -> (i32, i32, i32) {
    %c0_i32 = arith.constant 0 : i32
    %c0_i32_0 = arith.constant 0 : i32
    %c0_i32_1 = arith.constant 0 : i32
    %c0_i32_2 = arith.constant 0 : i32
    return %c0_i32, %c0_i32_0, %c0_i32_1 : i32, i32, i32
  }
  func.func @transform_1(%arg0: i32) -> (i32, i32, i32) {
    %c0_i32 = arith.constant 0 : i32
    %c0_i32_0 = arith.constant 0 : i32
    %c0_i32_1 = arith.constant 0 : i32
    %c0_i32_2 = arith.constant 0 : i32
    return %c0_i32, %c0_i32_0, %c0_i32_1 : i32, i32, i32
  }
  func.func @transform_2(%arg0: i32) -> (i32, i32, i32) {
    %c0_i32 = arith.constant 0 : i32
    %c0_i32_0 = arith.constant 0 : i32
    %c0_i32_1 = arith.constant 0 : i32
    %c0_i32_2 = arith.constant 0 : i32
    return %c0_i32, %c0_i32_0, %c0_i32_1 : i32, i32, i32
  }
  func.func @transform_3(%arg0: i32) -> (i32, i32) {
    %c0_i32 = arith.constant 0 : i32
    %c0_i32_0 = arith.constant 0 : i32
    %c0_i32_1 = arith.constant 0 : i32
    return %c0_i32, %c0_i32_0 : i32, i32
  }
  func.func @transform_4(%arg0: i32) -> (i32, i32) {
    %c0_i32 = arith.constant 0 : i32
    %c0_i32_0 = arith.constant 0 : i32
    %c0_i32_1 = arith.constant 0 : i32
    return %c0_i32, %c0_i32_0 : i32, i32
  }
  func.func @transform_5(%arg0: i32) -> (i32, i32, i32) {
    %c0_i32 = arith.constant 0 : i32
    %c0_i32_0 = arith.constant 0 : i32
    %c0_i32_1 = arith.constant 0 : i32
    %c0_i32_2 = arith.constant 0 : i32
    return %c0_i32, %c0_i32_0, %c0_i32_1 : i32, i32, i32
  }
  func.func @transform_6(%arg0: i32) -> (i32, i32) {
    %c0_i32 = arith.constant 0 : i32
    %c0_i32_0 = arith.constant 0 : i32
    %c0_i32_1 = arith.constant 0 : i32
    return %c0_i32, %c0_i32_0 : i32, i32
  }
  func.func @transform_7(%arg0: i32) -> (i32, i32) {
    %c0_i32 = arith.constant 0 : i32
    %c0_i32_0 = arith.constant 0 : i32
    %c0_i32_1 = arith.constant 0 : i32
    return %c0_i32, %c0_i32_0 : i32, i32
  }
  func.func @transform_8(%arg0: i32) -> (i32, i32) {
    %c0_i32 = arith.constant 0 : i32
    %c0_i32_0 = arith.constant 0 : i32
    %c0_i32_1 = arith.constant 0 : i32
    return %c0_i32, %c0_i32_0 : i32, i32
  }
  func.func @transform_9(%arg0: i32) -> (i32, i32) {
    %c0_i32 = arith.constant 0 : i32
    %c0_i32_0 = arith.constant 0 : i32
    %c0_i32_1 = arith.constant 0 : i32
    return %c0_i32, %c0_i32_0 : i32, i32
  }
  func.func @transform_10(%arg0: i32) -> (i32, i32) {
    %c0_i32 = arith.constant 0 : i32
    %c0_i32_0 = arith.constant 0 : i32
    %c0_i32_1 = arith.constant 0 : i32
    return %c0_i32, %c0_i32_0 : i32, i32
  }
  func.func @transform_11(%arg0: i32) -> (i32, i32) {
    %c0_i32 = arith.constant 0 : i32
    %c0_i32_0 = arith.constant 0 : i32
    %c0_i32_1 = arith.constant 0 : i32
    return %c0_i32, %c0_i32_0 : i32, i32
  }
}

</mosaic_0001>

<bundles_post_ra>
// kernel: xresnet_block_forward.1
= control target key start
LH: loop header
LB: loop body
LE: loop exit
PB: predicated region body
PF: predicated region fallthrough
CT: control target
= control target key end

     0   :  { %v1965_v2 = vmov 0.0   ;;  %vm1966_vm0 = vmmov 0   ;;  %s1967_s21 = smov 8   ;;  %s1968_s24 = smov 9   ;;  %vm78_vm1 = vcmask 1043456   ;;  %vm74_vm2 = vcmask 31744   ;;  %s2274_s0 = inlined_call_operand.vmem [shape: f32[4,4,128], index: 0, kind: input, shape index: {}]   ;;  %s2275_s1 = inlined_call_operand.vmem [shape: f32[9,1,128], index: 1, kind: input, shape index: {}]   ;;  %s2276_s2 = inlined_call_operand.vmem [shape: f32[9,8,4], index: 2, kind: input, shape index: {}]   ;;  %s2277_s8 = inlined_call_operand.vmem [shape: f32[8,4], index: 8, kind: input, shape index: {}]   ;;  %s2278_s4 = inlined_call_operand.vmem [shape: f32[8,1], index: 4, kind: input, shape index: {}]   ;;  %s2279_s3 = inlined_call_operand.vmem [shape: f32[8,1], index: 3, kind: input, shape index: {}]   ;;  %s2280_s6 = inlined_call_operand.vmem [shape: f32[8,1], index: 6, kind: input, shape index: {}]   ;;  %s2281_s5 = inlined_call_operand.vmem [shape: f32[9,8,8], index: 5, kind: input, shape index: {}]   ;;  %s2282_s9 = inlined_call_operand.vmem [shape: f32[8,1], index: 9, kind: input, shape index: {}]   ;;  %s2283_s7 = inlined_call_operand.vmem [shape: f32[8,1], index: 7, kind: input, shape index: {}]   ;;  %s2284_s10 = inlined_call_operand.vmem [shape: f32[8,1], index: 10, kind: input, shape index: {}]   ;;  %s2285_s11 = inlined_call_operand.vmem [shape: f32[8,128], index: 11, kind: output, shape index: {}]  }
   0x1   :  { %v2039_v0 = vld [vmem:[%s2274_s0 + $0x8] sm:$0xf]  ;;  %v2044_v1 = vld [vmem:[%s2274_s0 + $0xc] sm:$0xf]  ;;  %1819 = vmatprep.subr.mxu0 %v1965_v2  ;;  %1821 = vmatprep.mubr.msk.f32.mxu0 %vm1966_vm0, %v1965_v2  ;;  %v1718_v3 = vld [vmem:[%s2274_s0 + $0x4] sm:$0xf] }
   0x2   :  { %59 = vrot.lane.b32.xlu0 %v2039_v0, %s1967_s21  ;;  %228 = vrot.lane.b32.xlu1 %v2044_v1, %s1967_s21  ;;  %s1969_s25 = smov 1   ;;  %v2067_v4 = vld [vmem:[%s2275_s1 + $0x1] ss:$0 sm:$0xff]  ;;  %v1724_v7 = vld [vmem:[%s2276_s2 + $0x8] sm:$0xff]  ;;  %v1970_v34 = vmov 0   ;;  %s1973_s20 = smov 127  }
   0x3   :  { %1864 = vmatprep.subr.mxu1 %v1965_v2  ;;  %1866 = vmatprep.mubr.msk.f32.mxu1 %vm1966_vm0, %v1965_v2  ;;  %v2076_v8 = vld [vmem:[%s2275_s1] ss:$0 sm:$0xff]  ;;  %v2097_v14 = vld [vmem:[%s2275_s1 + $0x3] ss:$0 sm:$0xff]  ;;  %v1729_v16 = vld [vmem:[%s2276_s2 + $0x10] sm:$0xff]  ;;  %s1974_s22 = smov 121  }
   0x4   :  { %v57_v13 = vld [vmem:[%s2276_s2] sm:$0xff]  ;;  %v1734_v18 = vld [vmem:[%s2276_s2 + $0x18] sm:$0xff]  ;;  %v1740_v23 = vld [vmem:[%s2276_s2 + $0x28] sm:$0xff]  ;;  %1957 = vset.pattern.permute.xlu0 %v1970_v34  ;;  %1958 = vset.pattern.permute.xlu1 %v1970_v34  ;;  %s1975_s23 = smov 120   ;;  %vm62_vm3 = vcmask 64512  }
   0x5   :  { %v38_v19 = vld [vmem:[%s2274_s0] sm:$0xf]  ;;  %v1743_v24 = vld [vmem:[%s2276_s2 + $0x30] sm:$0xff]  ;;  %v1746_v27 = vld [vmem:[%s2276_s2 + $0x38] sm:$0xff] }
   0x6   :  { %46 = vrot.lane.b32.xlu0 %v2044_v1, %s1968_s24  ;;  %312 = vrot.lane.b32.xlu1 %v1718_v3, %s1969_s25  ;;  %v1737_v20 = vld [vmem:[%s2276_s2 + $0x20] sm:$0xff]  ;;  %v1605_v25 = vadd.f32 %v1718_v3, %v38_v19  ;;  %v1752_v56 = vld [vmem:[%s2281_s5 + $0x8] sm:$0xff] }
   0x7   :  { %v1749_v30 = vld [vmem:[%s2276_s2 + $0x40] sm:$0xff] }
   0x8   :  { %v1606_v26 = vadd.f32 %v2039_v0, %v1605_v25  ;;  %v1609_v31 = vld [vmem:[%s2277_s8] sm:$0xff] }
   0x9   :  { %v818_v35 = vld [vmem:[%s2278_s4] sm:$0xff]  ;;  %s1971_s4 = smov 119  }
   0xa   :  { %560 = vrot.lane.b32.xlu0 %v2044_v1, %s1969_s25  ;;  %v1607_v28 = vadd.f32 %v2044_v1, %v1606_v26  ;;  %v811_v40 = vld [vmem:[%s2279_s3] sm:$0xff]  ;;  %s1972_s3 = smov 7  }
   0xb   :  { %v1591_v53 = vld [vmem:[%s2280_s6] sm:$0xff] }
   0xc   :  { %v1608_v29 = vmul.f32 0.25, %v1607_v28  ;;  %v1756_v59 = vld [vmem:[%s2275_s1 + $0x2] ss:$0 sm:$0xff] }
   0xd   :  { %v831_v62 = vld [vmem:[%s2281_s5] sm:$0xff] }
  0x74   :  { %v60_v5 = vpop.permute.xlu0 %59  ;;  %v229_v11 = vpop.permute.xlu1 %228 }
  0x75   :  { %v71_v6 = vmul.f32 %v2067_v4, %v60_v5  ;;  %v231_v12 = vmul.f32 %v2067_v4, %v229_v11 }
  0x77   :  { %1820 = vmatpush3.msk.msra.mxu0 %vm78_vm1, %v71_v6  ;;  %v1761_v6 = vld [vmem:[%s2281_s5 + $0x20] sm:$0xff] }
  0x78   :  { %1822 = vmatmul.mubr.msk.f32.vlgmr.msra.gmra.mrb[0].mxu0 %vm74_vm2, %v1724_v7  ;;  %v47_v9 = vpop.permute.xlu0 %46  ;;  %1824 = vmatprep.subr.mxu0 %v1965_v2  ;;  %v313_v15 = vpop.permute.xlu1 %312 }
  0x79   :  { %v56_v10 = vmul.f32 %v2076_v8, %v47_v9  ;;  %1826 = vmatprep.mubr.msk.f32.mxu0 %vm1966_vm0, %v1965_v2  ;;  %v323_v17 = vmul.f32 %v2097_v14, %v313_v15 }
  0x7b   :  { %1825 = vmatpush3.msk.msra.mxu0 %vm78_vm1, %v56_v10  ;;  %v1765_v10 = vld [vmem:[%s2281_s5 + $0x28] sm:$0xff] }
  0x7c   :  { %1829 = vmatprep.subr.mxu0 %v1965_v2  ;;  %v561_v21 = vpop.permute.xlu0 %560 }
  0x7d   :  { %v563_v22 = vmul.f32 %v2097_v14, %v561_v21 }
  0x80   :  { %1827 = vmatmul.mubr.msk.f32.vlgmr.msra.gmra.mrb[0].mxu0 %vm74_vm2, %v57_v13 }
  0x81   :  { %1830 = vmatpush3.msk.msra.mxu0 %vm78_vm1, %v231_v12  ;;  %1831 = vmatprep.mubr.msk.f32.mxu0 %vm1966_vm0, %v1965_v2  ;;  %v1772_v12 = vld [vmem:[%s2275_s1 + $0x7] ss:$0 sm:$0xff] }
  0x82   :  { %1834 = vmatprep.subr.mxu0 %v1965_v2 }
  0x88   :  { %1832 = vmatmul.mubr.msk.f32.vlgmr.msra.gmra.mrb[0].mxu0 %vm74_vm2, %v1729_v16  ;;  %v1776_v16 = vld [vmem:[%s2275_s1 + $0x8] ss:$0 sm:$0xff] }
  0x89   :  { %1835 = vmatpush3.msk.msra.mxu0 %vm78_vm1, %v323_v17  ;;  %1836 = vmatprep.mubr.msk.f32.mxu0 %vm1966_vm0, %v1965_v2 }
  0x8a   :  { %1839 = vmatprep.subr.mxu0 %v1965_v2 }
  0x90   :  { %1837 = vmatmul.mubr.msk.f32.vlgmr.msra.gmra.mrb[0].mxu0 %vm74_vm2, %v1734_v18  ;;  %v1773_v18 = vld [vmem:[%s2281_s5 + $0x38] sm:$0xff] }
  0x91   :  { %1840 = vmatpush3.msk.msra.mxu0 %vm78_vm1, %v38_v19  ;;  %1841 = vmatprep.mubr.msk.f32.mxu0 %vm1966_vm0, %v1965_v2 }
  0x92   :  { %1844 = vmatprep.subr.mxu0 %v1965_v2 }
  0x98   :  { %1842 = vmatmul.mubr.msk.f32.vlgmr.msra.gmra.mrb[0].mxu0 %vm74_vm2, %v1737_v20  ;;  %v1777_v20 = vld [vmem:[%s2281_s5 + $0x40] sm:$0xff] }
  0x99   :  { %1845 = vmatpush3.msk.msra.mxu0 %vm78_vm1, %v1718_v3  ;;  %1846 = vmatprep.mubr.msk.f32.mxu0 %vm1966_vm0, %v1965_v2  ;;  %v1759_v3 = vld [vmem:[%s2281_s5 + $0x18] sm:$0xff] }
  0x9a   :  { %1849 = vmatprep.subr.mxu0 %v1965_v2 }
  0xa0   :  { %1847 = vmatmul.mubr.msk.f32.vlgmr.msra.gmra.mrb[0].mxu0 %vm74_vm2, %v1740_v23 }
  0xa1   :  { %1850 = vmatpush3.msk.msra.mxu0 %vm78_vm1, %v563_v22  ;;  %1851 = vmatprep.mubr.msk.f32.mxu0 %vm1966_vm0, %v1965_v2 }
  0xa2   :  { %1854 = vmatprep.subr.mxu0 %v1965_v2 }
  0xa8   :  { %1852 = vmatmul.mubr.msk.f32.vlgmr.msra.gmra.mrb[0].mxu0 %vm74_vm2, %v1743_v24 }
  0xa9   :  { %1855 = vmatpush3.msk.msra.mxu0 %vm78_vm1, %v2039_v0  ;;  %1856 = vmatprep.mubr.msk.f32.mxu0 %vm1966_vm0, %v1965_v2  ;;  %v1757_v0 = vld [vmem:[%s2281_s5 + $0x10] sm:$0xff] }
  0xaa   :  { %1859 = vmatprep.subr.mxu0 %v1965_v2 }
  0xb0   :  { %1857 = vmatmul.mubr.msk.f32.vlgmr.msra.gmra.mrb[0].mxu0 %vm74_vm2, %v1746_v27  ;;  %v1697_v27 = vld [vmem:[%s2282_s9] sm:$0xff] }
  0xb1   :  { %1860 = vmatpush3.msk.msra.mxu0 %vm78_vm1, %v2044_v1  ;;  %1861 = vmatprep.mubr.msk.f32.mxu0 %vm1966_vm0, %v1965_v2 }
  0xb2   :  { %1909 = vmatprep.subr.mxu0 %v1965_v2 }
  0xb8   :  { %1862 = vmatmul.mubr.msk.f32.vlgmr.msra.gmra.mrb[0].mxu0 %vm74_vm2, %v1749_v30 }
  0xb9   :  { %1910 = vmatpush3.msk.msra.mxu0 %vm78_vm1, %v1608_v29  ;;  %1911 = vmatprep.mubr.msk.f32.mxu0 %vm1966_vm0, %v1965_v2 }
  0xbc   :  { %1912 = vmatmul.mubr.msk.f32.vlgmr.msra.gmra.mrb[2].mxu0 %vm74_vm2, %v1609_v31 }
 0x18b   :  { %v794_v32 = vpop.f32.mrb[0].mxu0 }
 0x18c   :  { %799 = vadd.xlane.f32.xlu1 %v794_v32  ;;  %v1863_v33 = vpop.f32.mrb[1].mxu0 }
 0x18f   :  { %v2174_v41 = vpop.f32.mrb[2].mxu0 }
 0x190   :  { %v1913_v42 = vpop.f32.mrb[3].mxu0 }
 0x19d   :  { %821 = vperm.xlu1 %1958, %v818_v35  }
 0x219   :  { %v800_v36 = vpop.xlane.xlu1 %799 }
 0x21a   :  { %v802_v37 = vmul.f32 0.0078125, %v800_v36 }
 0x21c   :  { %v803_v38 = vsub.f32 %v794_v32, %v802_v37  ;;  %v1704_v32 = vld [vmem:[%s2284_s10] sm:$0xff] }
 0x21d   :  { %v822_v49 = vpop.permute.xlu1 %821 }
 0x21e   :  { %v804_v39 = vmul.f32 %v803_v38, %v803_v38 }
 0x220   :  { %805 = vadd.xlane.f32.xlu0 %v804_v39 }
 0x236   :  { %814 = vperm.xlu0 %1957, %v811_v40  }
 0x2ad   :  { %v806_v43 = vpop.xlane.xlu0 %805 }
 0x2ae   :  { %v807_v44 = vmul.f32 0.0078125, %v806_v43 }
 0x2b0   :  { %v808_v45 = vadd.f32 1e-05, %v807_v44 }
 0x2b2   :  { %1959 = vrsqrt.f32 %v808_v45 }
 0x2b5   :  { %v815_v47 = vpop.permute.xlu0 %814 }
 0x2bc   :  { %v1960_v46 = vpop.eup %1959 }
 0x2bd   :  { %v810_v48 = vmul.f32 %v1960_v46, %v803_v38 }
 0x2bf   :  { %v817_v50 = vmul.f32 %v815_v47, %v810_v48 }
 0x2c1   :  { %v824_v51 = vadd.f32 %v822_v49, %v817_v50 }
 0x2c3   :  { %v825_v52 = vmax.f32 %v824_v51, 0.0 }
 0x2c5   :  { %1492 = vrot.lane.b32.xlu0 %v825_v52, %s1971_s4  ;;  %832 = vrot.lane.b32.xlu1 %v825_v52, %s1967_s21 }
 0x2c9   :  { %827 = vrot.lane.b32.xlu1 %v825_v52, %s1968_s24 }
 0x2cd   :  { %984 = vrot.lane.b32.xlu1 %v825_v52, %s1972_s3 }
 0x2d1   :  { %1072 = vrot.lane.b32.xlu1 %v825_v52, %s1969_s25 }
 0x2d5   :  { %1228 = vrot.lane.b32.xlu1 %v825_v52, %s1973_s20 }
 0x2d9   :  { %1316 = vrot.lane.b32.xlu1 %v825_v52, %s1974_s22 }
 0x2dd   :  { %1404 = vrot.lane.b32.xlu1 %v825_v52, %s1975_s23 }
 0x2e4   :  { %1686 = vadd.xlane.f32.xlu0 %v2174_v41 }
 0x2fa   :  { %1594 = vperm.xlu0 %1957, %v1591_v53  }
 0x337   :  { %v833_v54 = vpop.permute.xlu1 %832  ;;  %v1493_v17 = vpop.permute.xlu0 %1492 }
 0x338   :  { %v835_v55 = vmul.f32 %v2067_v4, %v833_v54  ;;  %v1764_v4 = vld [vmem:[%s2275_s1 + $0x5] ss:$0 sm:$0xff]  ;;  %v1503_v19 = vmul.f32 %v1776_v16, %v1493_v17 }
 0x33a   :  { %1865 = vmatpush3.msra.mxu1 %v835_v55 }
 0x33b   :  { %1867 = vmatmul.mubr.msk.f32.vlgmr.msra.gmra.mrb[0].mxu1 %vm62_vm3, %v1752_v56  ;;  %v828_v57 = vpop.permute.xlu1 %827  ;;  %1869 = vmatprep.subr.mxu1 %v1965_v2 }
 0x33c   :  { %v830_v58 = vmul.f32 %v2076_v8, %v828_v57  ;;  %1871 = vmatprep.mubr.msk.f32.mxu1 %vm1966_vm0, %v1965_v2  ;;  %v1768_v8 = vld [vmem:[%s2275_s1 + $0x6] ss:$0 sm:$0xff] }
 0x33e   :  { %1870 = vmatpush3.msra.mxu1 %v830_v58 }
 0x33f   :  { %v985_v60 = vpop.permute.xlu1 %984  ;;  %1874 = vmatprep.subr.mxu1 %v1965_v2 }
 0x340   :  { %v995_v61 = vmul.f32 %v1756_v59, %v985_v60 }
 0x343   :  { %1872 = vmatmul.mubr.msk.f32.vlgmr.msra.gmra.mrb[0].mxu1 %vm62_vm3, %v831_v62  ;;  %v1073_v63 = vpop.permute.xlu1 %1072 }
 0x344   :  { %1875 = vmatpush3.msra.mxu1 %v995_v61  ;;  %1876 = vmatprep.mubr.msk.f32.mxu1 %vm1966_vm0, %v1965_v2  ;;  %v1075_v1 = vmul.f32 %v2097_v14, %v1073_v63  ;;  %v1769_v14 = vld [vmem:[%s2281_s5 + $0x30] sm:$0xff] }
 0x345   :  { %1879 = vmatprep.subr.mxu1 %v1965_v2 }
 0x347   :  { %v1229_v5 = vpop.permute.xlu1 %1228 }
 0x348   :  { %v1239_v7 = vmul.f32 %v1764_v4, %v1229_v5 }
 0x34b   :  { %1877 = vmatmul.mubr.msk.f32.vlgmr.msra.gmra.mrb[0].mxu1 %vm62_vm3, %v1757_v0  ;;  %v1317_v9 = vpop.permute.xlu1 %1316 }
 0x34c   :  { %1880 = vmatpush3.msra.mxu1 %v1075_v1  ;;  %1881 = vmatprep.mubr.msk.f32.mxu1 %vm1966_vm0, %v1965_v2  ;;  %v1327_v11 = vmul.f32 %v1768_v8, %v1317_v9 }
 0x34d   :  { %1884 = vmatprep.subr.mxu1 %v1965_v2 }
 0x34f   :  { %v1405_v13 = vpop.permute.xlu1 %1404 }
 0x350   :  { %v1415_v15 = vmul.f32 %v1772_v12, %v1405_v13 }
 0x353   :  { %1882 = vmatmul.mubr.msk.f32.vlgmr.msra.gmra.mrb[0].mxu1 %vm62_vm3, %v1759_v3 }
 0x354   :  { %1885 = vmatpush3.msra.mxu1 %v825_v52  ;;  %1886 = vmatprep.mubr.msk.f32.mxu1 %vm1966_vm0, %v1965_v2 }
 0x355   :  { %1889 = vmatprep.subr.mxu1 %v1965_v2 }
 0x35b   :  { %1887 = vmatmul.mubr.msk.f32.vlgmr.msra.gmra.mrb[0].mxu1 %vm62_vm3, %v1761_v6 }
 0x35c   :  { %1890 = vmatpush3.msra.mxu1 %v1239_v7  ;;  %1891 = vmatprep.mubr.msk.f32.mxu1 %vm1966_vm0, %v1965_v2 }
 0x35d   :  { %1894 = vmatprep.subr.mxu1 %v1965_v2 }
 0x363   :  { %1892 = vmatmul.mubr.msk.f32.vlgmr.msra.gmra.mrb[0].mxu1 %vm62_vm3, %v1765_v10 }
 0x364   :  { %1895 = vmatpush3.msra.mxu1 %v1327_v11  ;;  %1896 = vmatprep.mubr.msk.f32.mxu1 %vm1966_vm0, %v1965_v2 }
 0x365   :  { %1899 = vmatprep.subr.mxu1 %v1965_v2 }
 0x36b   :  { %1897 = vmatmul.mubr.msk.f32.vlgmr.msra.gmra.mrb[0].mxu1 %vm62_vm3, %v1769_v14 }
 0x36c   :  { %1900 = vmatpush3.msra.mxu1 %v1415_v15  ;;  %1901 = vmatprep.mubr.msk.f32.mxu1 %vm1966_vm0, %v1965_v2 }
 0x36d   :  { %1904 = vmatprep.subr.mxu1 %v1965_v2 }
 0x371   :  { %v1687_v21 = vpop.xlane.xlu0 %1686 }
 0x372   :  { %v1688_v22 = vmul.f32 0.0078125, %v1687_v21 }
 0x373   :  { %1902 = vmatmul.mubr.msk.f32.vlgmr.msra.gmra.mrb[0].mxu1 %vm62_vm3, %v1773_v18 }
 0x374   :  { %1905 = vmatpush3.msra.mxu1 %v1503_v19  ;;  %1906 = vmatprep.mubr.msk.f32.mxu1 %vm1966_vm0, %v1965_v2  ;;  %v1689_v23 = vsub.f32 %v2174_v41, %v1688_v22  ;;  %v1598_v2 = vld [vmem:[%s2283_s7] sm:$0xff] }
 0x376   :  { %v1690_v26 = vmul.f32 %v1689_v23, %v1689_v23 }
 0x379   :  { %v1595_v35 = vpop.permute.xlu0 %1594 }
 0x37b   :  { %1907 = vmatmul.mubr.msk.f32.vlgmr.msra.gmra.mrb[0].mxu1 %vm62_vm3, %v1777_v20 }
 0x44e   :  { %v1575_v24 = vpop.f32.mrb[0].mxu1 }
 0x44f   :  { %1580 = vadd.xlane.f32.xlu1 %v1575_v24  ;;  %v1908_v25 = vpop.f32.mrb[1].mxu1 }
 0x453   :  { %1691 = vadd.xlane.f32.xlu1 %v1690_v26 }
 0x464   :  { %1700 = vperm.xlu1 %1958, %v1697_v27  }
 0x468   :  { %1601 = vperm.xlu1 %1958, %v1598_v2  }
 0x4dc   :  { %v1581_v28 = vpop.xlane.xlu1 %1580 }
 0x4dd   :  { %v1582_v29 = vmul.f32 0.0078125, %v1581_v28 }
 0x4df   :  { %v1583_v30 = vsub.f32 %v1575_v24, %v1582_v29 }
 0x4e0   :  { %v1692_v33 = vpop.xlane.xlu1 %1691 }
 0x4e1   :  { %v1584_v31 = vmul.f32 %v1583_v30, %v1583_v30  ;;  %v1693_v34 = vmul.f32 0.0078125, %v1692_v33 }
 0x4e3   :  { %1585 = vadd.xlane.f32.xlu0 %v1584_v31  ;;  %v1694_v36 = vadd.f32 1e-05, %v1693_v34 }
 0x4e4   :  { %v1701_v41 = vpop.permute.xlu1 %1700 }
 0x4e5   :  { %1961 = vrsqrt.f32 %v1694_v36 }
 0x4e8   :  { %v1602_v48 = vpop.permute.xlu1 %1601 }
 0x4ef   :  { %v1962_v40 = vpop.eup %1961 }
 0x4f0   :  { %v1696_v42 = vmul.f32 %v1962_v40, %v1689_v23 }
 0x4f2   :  { %v1703_v46 = vmul.f32 %v1701_v41, %v1696_v42 }
 0x4f9   :  { %1707 = vperm.xlu0 %1957, %v1704_v32  }
 0x570   :  { %v1586_v37 = vpop.xlane.xlu0 %1585 }
 0x571   :  { %v1587_v38 = vmul.f32 0.0078125, %v1586_v37 }
 0x573   :  { %v1588_v39 = vadd.f32 1e-05, %v1587_v38 }
 0x575   :  { %1963 = vrsqrt.f32 %v1588_v39 }
 0x578   :  { %v1708_v45 = vpop.permute.xlu0 %1707 }
 0x579   :  { %v1710_v50 = vadd.f32 %v1708_v45, %v1703_v46 }
 0x57f   :  { %v1964_v43 = vpop.eup %1963 }
 0x580   :  { %v1590_v44 = vmul.f32 %v1964_v43, %v1583_v30 }
 0x582   :  { %v1597_v47 = vmul.f32 %v1595_v35, %v1590_v44 }
 0x584   :  { %v1604_v49 = vadd.f32 %v1602_v48, %v1597_v47 }
 0x586   :  { %v1711_v51 = vadd.f32 %v1710_v50, %v1604_v49 }
 0x588   :  { %v1712_v52 = vmax.f32 %v1711_v51, 0.0 }
 0x58a   :  { %1713 = vst [vmem:[%s2285_s11] sm:$0xff] %v1712_v52 }

</bundles_post_ra>
